<compile_context>
chip_gen: v6e
topology: v6e:2x2x1
jax: 0.10.0
libtpu: 0.0.40
codegen_flags: <defaults>
</compile_context>

<pallas_src>
import jax
import jax.numpy as jnp
from jax import lax
from jax.experimental import pallas as pl
from jax.experimental.pallas import tpu as pltpu

NEG_SLOPE_ATT = 0.2    # GATConv attention LeakyReLU slope (PyG default)
NEG_SLOPE_ACT = 0.01   # nn.LeakyReLU() default slope (model activation)
LANE = 128             # lane-dense padding target for feature dims
SUBLANE = 8


def _leaky_relu(x, slope):
    return jnp.where(x >= 0, x, slope * x)


def _gat(h_in, mask_add, w, att_src, att_dst, bias):
    """One GATConv(heads=1, concat=True) + fused model LeakyReLU (VMEM values)."""
    # h = x @ w.T  -> [Np, LANE]   (contract feature dims, no explicit transpose)
    h = lax.dot_general(h_in, w, (((1,), (1,)), ((), ())),
                        preferred_element_type=jnp.float32)
    # per-destination-node scalar: VPU multiply + cross-lane reduce (no MXU)
    e_dst = jnp.sum(h * att_dst, axis=-1, keepdims=True)             # [Np, 1]
    # per-source-node scalar as a row vector
    e_src = lax.dot_general(att_src, h, (((1,), (1,)), ((), ())),
                            preferred_element_type=jnp.float32)      # [1, Np]
    # logits[i, j] = LeakyReLU(e_dst[i] + e_src[j], 0.2) + (0 | -1e30)
    logits = _leaky_relu(e_dst + e_src, NEG_SLOPE_ATT) + mask_add    # [Np, Np]
    # softmax over source nodes j (self-loops guarantee a finite max per row)
    m = jnp.max(logits, axis=-1, keepdims=True)
    p = jnp.exp(logits - m)                    # masked entries underflow to 0
    denom = jnp.sum(p, axis=-1, keepdims=True)
    alpha = p * pl.reciprocal(denom, approx=True)
    # aggregate messages: out[i] = sum_j alpha[i, j] * h[j]  (+ bias)
    out = jnp.dot(alpha, h, preferred_element_type=jnp.float32) + bias
    # fused model activation (LeakyReLU, slope 0.01) applied after each layer
    return _leaky_relu(out, NEG_SLOPE_ACT)


def gnn_kernel(x_ref, adj_ref,
               w1_ref, a1s_ref, a1d_ref, b1_ref,
               w2_ref, a2s_ref, a2d_ref, b2_ref,
               wo_ref, bo_ref,
               out_ref):
    # additive attention mask, built once and reused by both GAT layers
    adj = adj_ref[...].astype(jnp.float32)           # int8 {0,1} -> f32
    mask_add = jnp.where(adj > 0, 0.0, -1e30)        # [Np, Np]

    h = _gat(x_ref[...], mask_add,
             w1_ref[...], a1s_ref[...], a1d_ref[...], b1_ref[...])
    h = _gat(h, mask_add,
             w2_ref[...], a2s_ref[...], a2d_ref[...], b2_ref[...])
    # output Linear(hidden, output): out = h @ w_out.T + b_out
    out_ref[...] = lax.dot_general(h, wo_ref[...], (((1,), (1,)), ((), ())),
                                   preferred_element_type=jnp.float32) + bo_ref[...]


# ----------------------------- host-side glue -------------------------------

def _round_up(n, m):
    return ((n + m - 1) // m) * m


def _pad2(a, rows, cols):
    out = jnp.zeros((rows, cols), a.dtype)
    return out.at[:a.shape[0], :a.shape[1]].set(a)


def build_dense_adjacency(edge_index, num_nodes, padded_nodes):
    # edge_index[0] = sources, edge_index[1] = targets (PyG convention):
    # adj[i, j] = 1 iff edge j -> i.  GATConv default add_self_loops=True.
    # Self-loops are also added for padded rows so their softmax stays finite
    # (padded rows are sliced away and never feed valid destinations).
    del num_nodes
    adj = jnp.zeros((padded_nodes, padded_nodes), jnp.int8)
    adj = adj.at[edge_index[1], edge_index[0]].set(jnp.int8(1))
    adj = jnp.maximum(adj, jnp.eye(padded_nodes, dtype=jnp.int8))
    return adj


def prepare_params(params):
    """Zero-pad all parameter lane dims to 128 once, outside the forward path."""
    return {
        "w1": _pad2(params["w1"], LANE, LANE),
        "a1_src": _pad2(params["a1_src"], 1, LANE),
        "a1_dst": _pad2(params["a1_dst"], 1, LANE),
        "b1": _pad2(params["b1"], 1, LANE),
        "w2": _pad2(params["w2"], LANE, LANE),
        "a2_src": _pad2(params["a2_src"], 1, LANE),
        "a2_dst": _pad2(params["a2_dst"], 1, LANE),
        "b2": _pad2(params["b2"], 1, LANE),
        "w_out": _pad2(params["w_out"], LANE, LANE),
        "b_out": _pad2(params["b_out"], 1, LANE),
    }


def gnn_forward(x_pad, adj, pp):
    """Fused forward pass. Returns padded output [n_pad, LANE]."""
    n_pad = x_pad.shape[0]
    vmem = lambda: pl.BlockSpec(memory_space=pltpu.MemorySpace.VMEM)
    return pl.pallas_call(
        gnn_kernel,
        out_shape=jax.ShapeDtypeStruct((n_pad, LANE), jnp.float32),
        in_specs=[vmem() for _ in range(12)],
        out_specs=vmem(),
    )(x_pad, adj,
      pp["w1"], pp["a1_src"], pp["a1_dst"], pp["b1"],
      pp["w2"], pp["a2_src"], pp["a2_dst"], pp["b2"],
      pp["w_out"], pp["b_out"])


if __name__ == "__main__":
    N, F_IN, HID, F_OUT = 8, 3, 20, 20

    key = jax.random.PRNGKey(0)
    keys = jax.random.split(key, 10)

    # deterministic node features
    x = jax.random.normal(keys[0], (N, F_IN), jnp.float32)

    # deterministic small graph: bidirectional ring on N nodes
    src = jnp.arange(N, dtype=jnp.int32)
    dst = (src + 1) % N
    edge_index = jnp.stack([jnp.concatenate([src, dst]),
                            jnp.concatenate([dst, src])])  # [2, 2N]

    # deterministic synthetic parameters (GATConv heads=1, concat=True)
    params = {
        "w1": 0.3 * jax.random.normal(keys[1], (HID, F_IN), jnp.float32),
        "a1_src": 0.3 * jax.random.normal(keys[2], (1, HID), jnp.float32),
        "a1_dst": 0.3 * jax.random.normal(keys[3], (1, HID), jnp.float32),
        "b1": jnp.zeros((1, HID), jnp.float32),
        "w2": 0.3 * jax.random.normal(keys[4], (HID, HID), jnp.float32),
        "a2_src": 0.3 * jax.random.normal(keys[5], (1, HID), jnp.float32),
        "a2_dst": 0.3 * jax.random.normal(keys[6], (1, HID), jnp.float32),
        "b2": jnp.zeros((1, HID), jnp.float32),
        "w_out": 0.3 * jax.random.normal(keys[7], (F_OUT, HID), jnp.float32),
        "b_out": 0.1 * jax.random.normal(keys[8], (1, F_OUT), jnp.float32),
    }

    # one-time host-side prep (hoisted out of the forward path)
    n_pad = _round_up(N, SUBLANE)
    x_pad = _pad2(x, n_pad, LANE)
    adj = build_dense_adjacency(edge_index, N, n_pad)
    pp = prepare_params(params)

    fwd = jax.jit(gnn_forward)
    out_pad = jax.block_until_ready(fwd(x_pad, adj, pp))
    out = out_pad[:N, :F_OUT]

    assert out.shape == (N, F_OUT), out.shape
    assert jnp.all(jnp.isfinite(out))
    print("KERNEL_OK")
</pallas_src>

<mosaic_0001>
module attributes {stable_mosaic.version = 11 : i64} {
  func.func @gnn_kernel(%arg0: memref<8x128xf32, #tpu.memory_space<vmem>>, %arg1: memref<8x8xi8, #tpu.memory_space<vmem>>, %arg2: memref<128x128xf32, #tpu.memory_space<vmem>>, %arg3: memref<1x128xf32, #tpu.memory_space<vmem>>, %arg4: memref<1x128xf32, #tpu.memory_space<vmem>>, %arg5: memref<1x128xf32, #tpu.memory_space<vmem>>, %arg6: memref<128x128xf32, #tpu.memory_space<vmem>>, %arg7: memref<1x128xf32, #tpu.memory_space<vmem>>, %arg8: memref<1x128xf32, #tpu.memory_space<vmem>>, %arg9: memref<1x128xf32, #tpu.memory_space<vmem>>, %arg10: memref<128x128xf32, #tpu.memory_space<vmem>>, %arg11: memref<1x128xf32, #tpu.memory_space<vmem>>, %arg12: memref<8x128xf32, #tpu.memory_space<vmem>>) attributes {dimension_semantics = [], scalar_prefetch = 0 : i64, scratch_operands = 0 : i64, tpu.core_type = #tpu.core_type<tc>} {
    %c0 = arith.constant 0 : index
    %c0_0 = arith.constant 0 : index
    %0 = vector.load %arg1[%c0, %c0_0] : memref<8x8xi8, #tpu.memory_space<vmem>>, vector<8x8xi8>
    %1 = arith.sitofp %0 : vector<8x8xi8> to vector<8x8xf32>
    %cst = arith.constant 0.000000e+00 : f32
    %2 = vector.broadcast %cst : f32 to vector<8x8xf32>
    %3 = arith.cmpf ogt, %1, %2 : vector<8x8xf32>
    %cst_1 = arith.constant 0.000000e+00 : f32
    %cst_2 = arith.constant -1.000000e+30 : f32
    %4 = vector.broadcast %cst_1 : f32 to vector<8x8xf32>
    %5 = vector.broadcast %cst_2 : f32 to vector<8x8xf32>
    %6 = arith.select %3, %4, %5 : vector<8x8xi1>, vector<8x8xf32>
    %c0_3 = arith.constant 0 : index
    %c0_4 = arith.constant 0 : index
    %7 = vector.load %arg0[%c0_3, %c0_4] : memref<8x128xf32, #tpu.memory_space<vmem>>, vector<8x128xf32>
    %c0_5 = arith.constant 0 : index
    %c0_6 = arith.constant 0 : index
    %8 = vector.load %arg2[%c0_5, %c0_6] : memref<128x128xf32, #tpu.memory_space<vmem>>, vector<128x128xf32>
    %c0_7 = arith.constant 0 : index
    %c0_8 = arith.constant 0 : index
    %9 = vector.load %arg3[%c0_7, %c0_8] : memref<1x128xf32, #tpu.memory_space<vmem>>, vector<1x128xf32>
    %c0_9 = arith.constant 0 : index
    %c0_10 = arith.constant 0 : index
    %10 = vector.load %arg4[%c0_9, %c0_10] : memref<1x128xf32, #tpu.memory_space<vmem>>, vector<1x128xf32>
    %c0_11 = arith.constant 0 : index
    %c0_12 = arith.constant 0 : index
    %11 = vector.load %arg5[%c0_11, %c0_12] : memref<1x128xf32, #tpu.memory_space<vmem>>, vector<1x128xf32>
    %cst_13 = arith.constant dense<0.000000e+00> : vector<8x128xf32>
    %12 = tpu.matmul %7, %8, %cst_13 {dimension_numbers = #tpu.dot_dimension_numbers<[1], [1], [0], [0], [0, 0, 1, 0], [], []>} : vector<8x128xf32>, vector<128x128xf32>, vector<8x128xf32> -> vector<8x128xf32>
    %13 = vector.broadcast %10 : vector<1x128xf32> to vector<8x128xf32>
    %14 = arith.mulf %12, %13 : vector<8x128xf32>
    %cst_14 = arith.constant dense<0.000000e+00> : vector<8xf32>
    %15 = vector.multi_reduction <add>, %14, %cst_14 [1] : vector<8x128xf32> to vector<8xf32>
    %16 = vector.shape_cast %15 : vector<8xf32> to vector<8x1xf32>
    %cst_15 = arith.constant dense<0.000000e+00> : vector<1x8xf32>
    %17 = tpu.matmul %9, %12, %cst_15 {dimension_numbers = #tpu.dot_dimension_numbers<[1], [1], [0], [0], [0, 0, 1, 0], [], []>} : vector<1x128xf32>, vector<8x128xf32>, vector<1x8xf32> -> vector<1x8xf32>
    %18 = vector.broadcast %16 : vector<8x1xf32> to vector<8x8xf32>
    %19 = vector.broadcast %17 : vector<1x8xf32> to vector<8x8xf32>
    %20 = arith.addf %18, %19 : vector<8x8xf32>
    %cst_16 = arith.constant 0.000000e+00 : f32
    %21 = vector.broadcast %cst_16 : f32 to vector<8x8xf32>
    %22 = arith.cmpf oge, %20, %21 : vector<8x8xf32>
    %cst_17 = arith.constant 2.000000e-01 : f32
    %23 = vector.broadcast %cst_17 : f32 to vector<8x8xf32>
    %24 = arith.mulf %23, %20 : vector<8x8xf32>
    %25 = arith.select %22, %20, %24 : vector<8x8xi1>, vector<8x8xf32>
    %26 = arith.addf %25, %6 : vector<8x8xf32>
    %cst_18 = arith.constant dense<0xFF800000> : vector<8xf32>
    %27 = vector.multi_reduction <maximumf>, %26, %cst_18 [1] : vector<8x8xf32> to vector<8xf32>
    %28 = vector.shape_cast %27 : vector<8xf32> to vector<8x1xf32>
    %29 = vector.broadcast %28 : vector<8x1xf32> to vector<8x8xf32>
    %30 = arith.subf %26, %29 : vector<8x8xf32>
    %31 = math.exp %30 : vector<8x8xf32>
    %cst_19 = arith.constant dense<0.000000e+00> : vector<8xf32>
    %32 = vector.multi_reduction <add>, %31, %cst_19 [1] : vector<8x8xf32> to vector<8xf32>
    %33 = vector.shape_cast %32 : vector<8xf32> to vector<8x1xf32>
    %34 = tpu.reciprocal %33 {approx = true} : vector<8x1xf32> -> vector<8x1xf32>
    %35 = vector.broadcast %34 : vector<8x1xf32> to vector<8x8xf32>
    %36 = arith.mulf %31, %35 : vector<8x8xf32>
    %cst_20 = arith.constant dense<0.000000e+00> : vector<8x128xf32>
    %37 = tpu.matmul %36, %12, %cst_20 {dimension_numbers = #tpu.dot_dimension_numbers<[1], [0], [0], [1], [0, 0, 1, 1], [], []>} : vector<8x8xf32>, vector<8x128xf32>, vector<8x128xf32> -> vector<8x128xf32>
    %38 = vector.broadcast %11 : vector<1x128xf32> to vector<8x128xf32>
    %39 = arith.addf %37, %38 : vector<8x128xf32>
    %cst_21 = arith.constant 0.000000e+00 : f32
    %40 = vector.broadcast %cst_21 : f32 to vector<8x128xf32>
    %41 = arith.cmpf oge, %39, %40 : vector<8x128xf32>
    %cst_22 = arith.constant 0.00999999977 : f32
    %42 = vector.broadcast %cst_22 : f32 to vector<8x128xf32>
    %43 = arith.mulf %42, %39 : vector<8x128xf32>
    %44 = arith.select %41, %39, %43 : vector<8x128xi1>, vector<8x128xf32>
    %c0_23 = arith.constant 0 : index
    %c0_24 = arith.constant 0 : index
    %45 = vector.load %arg6[%c0_23, %c0_24] : memref<128x128xf32, #tpu.memory_space<vmem>>, vector<128x128xf32>
    %c0_25 = arith.constant 0 : index
    %c0_26 = arith.constant 0 : index
    %46 = vector.load %arg7[%c0_25, %c0_26] : memref<1x128xf32, #tpu.memory_space<vmem>>, vector<1x128xf32>
    %c0_27 = arith.constant 0 : index
    %c0_28 = arith.constant 0 : index
    %47 = vector.load %arg8[%c0_27, %c0_28] : memref<1x128xf32, #tpu.memory_space<vmem>>, vector<1x128xf32>
    %c0_29 = arith.constant 0 : index
    %c0_30 = arith.constant 0 : index
    %48 = vector.load %arg9[%c0_29, %c0_30] : memref<1x128xf32, #tpu.memory_space<vmem>>, vector<1x128xf32>
    %cst_31 = arith.constant dense<0.000000e+00> : vector<8x128xf32>
    %49 = tpu.matmul %44, %45, %cst_31 {dimension_numbers = #tpu.dot_dimension_numbers<[1], [1], [0], [0], [0, 0, 1, 0], [], []>} : vector<8x128xf32>, vector<128x128xf32>, vector<8x128xf32> -> vector<8x128xf32>
    %50 = vector.broadcast %47 : vector<1x128xf32> to vector<8x128xf32>
    %51 = arith.mulf %49, %50 : vector<8x128xf32>
    %cst_32 = arith.constant dense<0.000000e+00> : vector<8xf32>
    %52 = vector.multi_reduction <add>, %51, %cst_32 [1] : vector<8x128xf32> to vector<8xf32>
    %53 = vector.shape_cast %52 : vector<8xf32> to vector<8x1xf32>
    %cst_33 = arith.constant dense<0.000000e+00> : vector<1x8xf32>
    %54 = tpu.matmul %46, %49, %cst_33 {dimension_numbers = #tpu.dot_dimension_numbers<[1], [1], [0], [0], [0, 0, 1, 0], [], []>} : vector<1x128xf32>, vector<8x128xf32>, vector<1x8xf32> -> vector<1x8xf32>
    %55 = vector.broadcast %53 : vector<8x1xf32> to vector<8x8xf32>
    %56 = vector.broadcast %54 : vector<1x8xf32> to vector<8x8xf32>
    %57 = arith.addf %55, %56 : vector<8x8xf32>
    %cst_34 = arith.constant 0.000000e+00 : f32
    %58 = vector.broadcast %cst_34 : f32 to vector<8x8xf32>
    %59 = arith.cmpf oge, %57, %58 : vector<8x8xf32>
    %cst_35 = arith.constant 2.000000e-01 : f32
    %60 = vector.broadcast %cst_35 : f32 to vector<8x8xf32>
    %61 = arith.mulf %60, %57 : vector<8x8xf32>
    %62 = arith.select %59, %57, %61 : vector<8x8xi1>, vector<8x8xf32>
    %63 = arith.addf %62, %6 : vector<8x8xf32>
    %cst_36 = arith.constant dense<0xFF800000> : vector<8xf32>
    %64 = vector.multi_reduction <maximumf>, %63, %cst_36 [1] : vector<8x8xf32> to vector<8xf32>
    %65 = vector.shape_cast %64 : vector<8xf32> to vector<8x1xf32>
    %66 = vector.broadcast %65 : vector<8x1xf32> to vector<8x8xf32>
    %67 = arith.subf %63, %66 : vector<8x8xf32>
    %68 = math.exp %67 : vector<8x8xf32>
    %cst_37 = arith.constant dense<0.000000e+00> : vector<8xf32>
    %69 = vector.multi_reduction <add>, %68, %cst_37 [1] : vector<8x8xf32> to vector<8xf32>
    %70 = vector.shape_cast %69 : vector<8xf32> to vector<8x1xf32>
    %71 = tpu.reciprocal %70 {approx = true} : vector<8x1xf32> -> vector<8x1xf32>
    %72 = vector.broadcast %71 : vector<8x1xf32> to vector<8x8xf32>
    %73 = arith.mulf %68, %72 : vector<8x8xf32>
    %cst_38 = arith.constant dense<0.000000e+00> : vector<8x128xf32>
    %74 = tpu.matmul %73, %49, %cst_38 {dimension_numbers = #tpu.dot_dimension_numbers<[1], [0], [0], [1], [0, 0, 1, 1], [], []>} : vector<8x8xf32>, vector<8x128xf32>, vector<8x128xf32> -> vector<8x128xf32>
    %75 = vector.broadcast %48 : vector<1x128xf32> to vector<8x128xf32>
    %76 = arith.addf %74, %75 : vector<8x128xf32>
    %cst_39 = arith.constant 0.000000e+00 : f32
    %77 = vector.broadcast %cst_39 : f32 to vector<8x128xf32>
    %78 = arith.cmpf oge, %76, %77 : vector<8x128xf32>
    %cst_40 = arith.constant 0.00999999977 : f32
    %79 = vector.broadcast %cst_40 : f32 to vector<8x128xf32>
    %80 = arith.mulf %79, %76 : vector<8x128xf32>
    %81 = arith.select %78, %76, %80 : vector<8x128xi1>, vector<8x128xf32>
    %c0_41 = arith.constant 0 : index
    %c0_42 = arith.constant 0 : index
    %82 = vector.load %arg10[%c0_41, %c0_42] : memref<128x128xf32, #tpu.memory_space<vmem>>, vector<128x128xf32>
    %cst_43 = arith.constant dense<0.000000e+00> : vector<8x128xf32>
    %83 = tpu.matmul %81, %82, %cst_43 {dimension_numbers = #tpu.dot_dimension_numbers<[1], [1], [0], [0], [0, 0, 1, 0], [], []>} : vector<8x128xf32>, vector<128x128xf32>, vector<8x128xf32> -> vector<8x128xf32>
    %c0_44 = arith.constant 0 : index
    %c0_45 = arith.constant 0 : index
    %84 = vector.load %arg11[%c0_44, %c0_45] : memref<1x128xf32, #tpu.memory_space<vmem>>, vector<1x128xf32>
    %85 = vector.broadcast %84 : vector<1x128xf32> to vector<8x128xf32>
    %86 = arith.addf %83, %85 : vector<8x128xf32>
    %c0_46 = arith.constant 0 : index
    %c0_47 = arith.constant 0 : index
    %87 = vector.load %arg12[%c0_46, %c0_47] : memref<8x128xf32, #tpu.memory_space<vmem>>, vector<8x128xf32>
    tpu.vector_store %arg12[%c0_46, %c0_47], %86 {strides = array<i32>} : memref<8x128xf32, #tpu.memory_space<vmem>>, vector<8x128xf32>,
    return
  }
}

</mosaic_0001>

<bundles_post_ra>
// kernel: gnn_forward.1
= control target key start
LH: loop header
LB: loop body
LE: loop exit
PB: predicated region body
PF: predicated region fallthrough
CT: control target
= control target key end

     0   :  { %17 = vsyncpa [#allocation3], 0  ;;  %s1309_s0 = inlined_call_operand.hbm [shape: f32[8,128], index: 0, kind: input, shape index: {}]   ;;  %s1310_s1 = inlined_call_operand.hbm [shape: s8[8,8], index: 1, kind: input, shape index: {}]   ;;  %s1311_s2 = inlined_call_operand.hbm [shape: f32[128,128], index: 2, kind: input, shape index: {}]   ;;  %s1312_s3 = inlined_call_operand.vmem [shape: f32[1,128], index: 3, kind: input, shape index: {}]   ;;  %s1313_s4 = inlined_call_operand.vmem [shape: f32[1,128], index: 4, kind: input, shape index: {}]   ;;  %s1314_s5 = inlined_call_operand.vmem [shape: f32[1,128], index: 5, kind: input, shape index: {}]   ;;  %s1315_s6 = inlined_call_operand.hbm [shape: f32[128,128], index: 6, kind: input, shape index: {}]   ;;  %s1316_s7 = inlined_call_operand.vmem [shape: f32[1,128], index: 7, kind: input, shape index: {}]   ;;  %s1317_s8 = inlined_call_operand.vmem [shape: f32[1,128], index: 8, kind: input, shape index: {}]   ;;  %s1318_s9 = inlined_call_operand.vmem [shape: f32[1,128], index: 9, kind: input, shape index: {}]   ;;  %s1319_s10 = inlined_call_operand.hbm [shape: f32[128,128], index: 10, kind: input, shape index: {}]   ;;  %s1320_s11 = inlined_call_operand.vmem [shape: f32[1,128], index: 11, kind: input, shape index: {}]   ;;  %s1321_s12 = inlined_call_operand.hbm [shape: f32[8,128], index: 12, kind: output, shape index: {}]  }
   0x1   :  { %18 = vsyncpa [#allocation6], 0 }
   0x2   :  { %19 = vsyncpa [#allocation9], 0 }
   0x3   :  { %20 = vsyncpa [#allocation4], 0  ;;  %s1102_s21 = smov [#allocation5]  }
   0x4   :  { %s37_s22 = sshll.u32 %s1102_s21, 4  ;;  %s38_s22 = int_to_ptr.vmem [resolvable:$true] %s37_s22 }
   0x5   :  { %s982_s23 = scalar_lea.vmem %s38_s22, 32  ;;  %p987_p1 = scmp.lt.s32.totalorder %s38_s22, %s38_s22 }
   0x6   :  { %p983_p0 = scmp.ne.s32.totalorder %s38_s22, %s982_s23  ;;  %p988_p2 = scmp.lt.s32.totalorder %s982_s23, %s982_s23 }
   0x8   :  { %p989_p3 = por %p988_p2, %p987_p1 }
   0xa   :  { %p990_p4 = pnand %p989_p3, %p983_p0 }
   0xc   :  { %993 = shalt.err (!%p990_p4)
}
   0xd   :  { %40 = dma.hbm_to_vmem [thread:$0]  %s1310_s1, 32, %s38_s22, [#allocation6]  }
   0xe   :  { %s1103_s26 = smov [#allocation8]   ;;  %s1104_s28 = smov [#allocation2]  }
   0xf   :  { %s64_s27 = sshll.u32 %s1103_s26, 4  ;;  %s27_s29 = sshll.u32 %s1104_s28, 4  ;;  %s65_s27 = int_to_ptr.vmem [resolvable:$true] %s64_s27  ;;  %s28_s29 = int_to_ptr.vmem [resolvable:$true] %s27_s29 }
  0x10   :  { %s1002_s30 = scalar_lea.vmem %s65_s27, 2048  ;;  %p1007_p6 = scmp.lt.s32.totalorder %s65_s27, %s65_s27 }
  0x11   :  { %p1003_p5 = scmp.ne.s32.totalorder %s65_s27, %s1002_s30  ;;  %p1008_p7 = scmp.lt.s32.totalorder %s1002_s30, %s1002_s30 }
  0x13   :  { %p1009_p8 = por %p1008_p7, %p1007_p6 }
  0x15   :  { %p1010_p9 = pnand %p1009_p8, %p1003_p5 }
  0x17   :  { %1013 = shalt.err (!%p1010_p9)
}
  0x18   :  { %s1105_s13 = smov 128   ;;  %s1106_s14 = smov 8  }
  0x19   :  { %70 = dma.hbm_to_vmem [thread:$0]  %s1315_s6, 2048, %s65_s27, [#allocation9], %s1105_s13, %s1105_s13, %s1106_s14  }
  0x1a   :  { %s1022_s1 = scalar_lea.vmem %s28_s29, 128  ;;  %p1027_p11 = scmp.lt.s32.totalorder %s28_s29, %s28_s29 }
  0x1b   :  { %p1023_p10 = scmp.ne.s32.totalorder %s28_s29, %s1022_s1  ;;  %p1028_p12 = scmp.lt.s32.totalorder %s1022_s1, %s1022_s1 }
  0x1d   :  { %p1029_p13 = por %p1028_p12, %p1027_p11 }
  0x1f   :  { %p1030_p0 = pnand %p1029_p13, %p1023_p10 }
  0x21   :  { %1033 = shalt.err (!%p1030_p0)
}
  0x22   :  { %30 = dma.hbm_to_vmem [thread:$0]  %s1309_s0, 128, %s28_s29, [#allocation3]  }
  0x23   :  { %s1107_s19 = smov [#allocation7]   ;;  %s1108_s21 = smov [#allocation10]  }
  0x24   :  { %s46_s20 = sshll.u32 %s1107_s19, 4  ;;  %s82_s22 = sshll.u32 %s1108_s21, 4  ;;  %s47_s20 = int_to_ptr.vmem [resolvable:$true] %s46_s20  ;;  %s83_s22 = int_to_ptr.vmem [resolvable:$true] %s82_s22 }
  0x25   :  { %s1042_s23 = scalar_lea.vmem %s47_s20, 2048  ;;  %p1047_p2 = scmp.lt.s32.totalorder %s47_s20, %s47_s20 }
  0x26   :  { %p1043_p1 = scmp.ne.s32.totalorder %s47_s20, %s1042_s23  ;;  %p1048_p3 = scmp.lt.s32.totalorder %s1042_s23, %s1042_s23 }
  0x28   :  { %p1049_p4 = por %p1048_p3, %p1047_p2 }
  0x2a   :  { %p1050_p5 = pnand %p1049_p4, %p1043_p1 }
  0x2c   :  { %1053 = shalt.err (!%p1050_p5)
}
  0x2d   :  { %52 = dma.hbm_to_vmem [thread:$0]  %s1311_s2, 2048, %s47_s20, [#allocation6], %s1105_s13, %s1105_s13, %s1106_s14  }
  0x2e   :  { %s1062_s0 = scalar_lea.vmem %s83_s22, 2048  ;;  %p1067_p7 = scmp.lt.s32.totalorder %s83_s22, %s83_s22 }
  0x2f   :  { %p1063_p6 = scmp.ne.s32.totalorder %s83_s22, %s1062_s0  ;;  %p1068_p8 = scmp.lt.s32.totalorder %s1062_s0, %s1062_s0 }
  0x31   :  { %p1069_p9 = por %p1068_p8, %p1067_p7 }
  0x33   :  { %p1070_p10 = pnand %p1069_p9, %p1063_p6 }
  0x35   :  { %1073 = shalt.err (!%p1070_p10)
}
  0x36   :  { %88 = dma.hbm_to_vmem [thread:$0]  %s1319_s10, 2048, %s83_s22, [#allocation9], %s1105_s13, %s1105_s13, %s1106_s14  }
  0x37   :  { %1094 = dma.done.wait [#allocation3], 128  }
  0x38   :  { %1095 = vsyncadd [#allocation3], 4294967168 }
  0x39   :  { %1096 = dma.done.wait [#allocation6], 2080  }
  0x3a   :  { %1097 = vsyncadd [#allocation6], 4294965216 }
  0x3b   :  { %1098 = dma.done.wait [#allocation9], 4096  }
  0x3c   :  { %1099 = vsyncadd [#allocation9], 4294963200  ;;  %v1109_v0 = vmov 0.0   ;;  %vm1110_vm0 = vmmov 0   ;;  %v127_v1 = vld [vmem:[#allocation7 + $0x78] sm:$0xff]  ;;  %v126_v2 = vld [vmem:[#allocation7 + $0x70] sm:$0xff]  ;;  %v280_v23 = vlaneseq }
  0x3d   :  { %830 = vmatprep.subr.mxu0 %v1109_v0  ;;  %862 = vmatprep.mubr.msk.f32.mxu0 %vm1110_vm0, %v1109_v0  ;;  %v125_v3 = vld [vmem:[#allocation7 + $0x68] sm:$0xff]  ;;  %v124_v4 = vld [vmem:[#allocation7 + $0x60] sm:$0xff]  ;;  %v123_v5 = vld [vmem:[#allocation7 + $0x58] sm:$0xff]  ;;  %v1111_v35 = vmov -1e+30   ;;  %vm289_vm3 = vcmask 64512  }
  0x3e   :  { %865 = vmatprep.subr.mxu1 %v1109_v0  ;;  %867 = vmatprep.mubr.msk.f32.mxu1 %vm1110_vm0, %v1109_v0  ;;  %v122_v6 = vld [vmem:[#allocation7 + $0x50] sm:$0xff]  ;;  %v121_v7 = vld [vmem:[#allocation7 + $0x48] sm:$0xff]  ;;  %v120_v8 = vld [vmem:[#allocation7 + $0x40] sm:$0xff]  ;;  %v1236_v25 = vshrl.u32 %v280_v23, 7  ;;  %s1112_s16 = smov [#allocation11]  }
  0x3f   :  { %831 = vmatpush3.xpose.msra.mxu0 %v127_v1  ;;  %v119_v9 = vld [vmem:[#allocation7 + $0x38] sm:$0xff]  ;;  %v118_v10 = vld [vmem:[#allocation7 + $0x30] sm:$0xff]  ;;  %v117_v11 = vld [vmem:[#allocation7 + $0x28] sm:$0xff]  ;;  %s753_s1 = sshll.u32 %s1112_s16, 4  ;;  %s754_s1 = int_to_ptr.vmem [resolvable:$true] %s753_s1 }
  0x40   :  { %832 = vmatprep.subr.mxu0 %v1109_v0  ;;  %v116_v12 = vld [vmem:[#allocation7 + $0x20] sm:$0xff]  ;;  %v115_v13 = vld [vmem:[#allocation7 + $0x18] sm:$0xff]  ;;  %v114_v14 = vld [vmem:[#allocation7 + $0x10] sm:$0xff]  ;;  %v282_v27 = vsub.s32 0, %v1236_v25  ;;  %s1074_s17 = scalar_lea.vmem %s754_s1, 128  ;;  %p1079_p12 = scmp.lt.s32.totalorder %s754_s1, %s754_s1 }
  0x41   :  { %v113_v15 = vld [vmem:[#allocation7 + $0x8] sm:$0xff]  ;;  %v112_v16 = vld [vmem:[#allocation7] sm:$0xff]  ;;  %v111_v17 = vld [vmem:[#allocation2] sm:$0xff]  ;;  %p1075_p11 = scmp.ne.s32.totalorder %s754_s1, %s1074_s17  ;;  %p1080_p13 = scmp.lt.s32.totalorder %s1074_s17, %s1074_s17 }
  0x42   :  { %v764_v18 = vld [vmem:[%s1313_s4] ss:$0 sm:$0xff]  ;;  %v106_v24 = vld [vmem:[#allocation5] sm:$0x3]  ;;  %v396_v50 = vld [vmem:[#allocation8 + $0x68] sm:$0xff] }
  0x43   :  { %833 = vmatpush3.xpose.msra.mxu0 %v126_v2  ;;  %v128_v21 = vld [vmem:[%s1312_s3] sm:$0x1]  ;;  %v107_v26 = vunpack.c.0.s8 %v106_v24  ;;  %v398_v48 = vld [vmem:[#allocation8 + $0x78] sm:$0xff]  ;;  %v395_v51 = vld [vmem:[#allocation8 + $0x60] sm:$0xff]  ;;  %p1081_p0 = por %p1080_p13, %p1079_p12 }
  0x44   :  { %834 = vmatprep.subr.mxu0 %v1109_v0  ;;  %v397_v49 = vld [vmem:[#allocation8 + $0x70] sm:$0xff]  ;;  %v394_v52 = vld [vmem:[#allocation8 + $0x58] sm:$0xff]  ;;  %v392_v54 = vld [vmem:[#allocation8 + $0x48] sm:$0xff] }
  0x45   :  { %v108_v28 = vcvt.s32.f32 %v107_v26  ;;  %v393_v53 = vld [vmem:[#allocation8 + $0x50] sm:$0xff]  ;;  %v391_v55 = vld [vmem:[#allocation8 + $0x40] sm:$0xff]  ;;  %v390_v56 = vld [vmem:[#allocation8 + $0x38] sm:$0xff]  ;;  %p1082_p1 = pnand %p1081_p0, %p1075_p11 }
  0x46   :  { %v389_v57 = vld [vmem:[#allocation8 + $0x30] sm:$0xff]  ;;  %v388_v58 = vld [vmem:[#allocation8 + $0x28] sm:$0xff]  ;;  %v387_v59 = vld [vmem:[#allocation8 + $0x20] sm:$0xff] }
  0x47   :  { %835 = vmatpush3.xpose.msra.mxu0 %v125_v3  ;;  %vm109_vm1 = vcmp.gt.f32.partialorder %v108_v28, 0.0  ;;  %v386_v60 = vld [vmem:[#allocation8 + $0x18] sm:$0xff]  ;;  %v385_v61 = vld [vmem:[#allocation8 + $0x10] sm:$0xff]  ;;  %v384_v62 = vld [vmem:[#allocation8 + $0x8] sm:$0xff] }
  0x48   :  { %836 = vmatprep.subr.mxu0 %v1109_v0  ;;  %v1241_v36 = vsel %vm109_vm1, 0.0, %v1111_v35  ;;  %v383_v63 = vld [vmem:[#allocation8] sm:$0xff]  ;;  %v765_v1 = vld [vmem:[%s1314_s5] ss:$0 sm:$0xff]  ;;  %v668_v25 = vld [vmem:[#allocation10 + $0x78] sm:$0xff] }
  0x49   :  { %v666_v28 = vld [vmem:[#allocation10 + $0x68] sm:$0xff]  ;;  %v659_v35 = vld [vmem:[#allocation10 + $0x30] sm:$0xff] }
  0x4b   :  { %837 = vmatpush3.xpose.msra.mxu0 %v124_v4 }
  0x4c   :  { %838 = vmatprep.subr.mxu0 %v1109_v0 }
  0x4f   :  { %839 = vmatpush3.xpose.msra.mxu0 %v123_v5 }
  0x50   :  { %840 = vmatprep.subr.mxu0 %v1109_v0 }
  0x53   :  { %841 = vmatpush3.xpose.msra.mxu0 %v122_v6 }
  0x54   :  { %842 = vmatprep.subr.mxu0 %v1109_v0 }
  0x57   :  { %843 = vmatpush3.xpose.msra.mxu0 %v121_v7  ;;  %v767_v7 = vld [vmem:[%s1317_s8] ss:$0 sm:$0xff] }
  0x58   :  { %844 = vmatprep.subr.mxu0 %v1109_v0 }
  0x5b   :  { %845 = vmatpush3.xpose.msra.mxu0 %v120_v8 }
  0x5c   :  { %846 = vmatprep.subr.mxu0 %v1109_v0 }
  0x5f   :  { %847 = vmatpush3.xpose.msra.mxu0 %v119_v9 }
  0x60   :  { %848 = vmatprep.subr.mxu0 %v1109_v0 }
  0x63   :  { %849 = vmatpush3.xpose.msra.mxu0 %v118_v10  ;;  %v399_v10 = vld [vmem:[%s1316_s7] sm:$0x1] }
  0x64   :  { %850 = vmatprep.subr.mxu0 %v1109_v0 }
  0x67   :  { %851 = vmatpush3.xpose.msra.mxu0 %v117_v11 }
  0x68   :  { %852 = vmatprep.subr.mxu0 %v1109_v0 }
  0x6b   :  { %853 = vmatpush3.xpose.msra.mxu0 %v116_v12 }
  0x6c   :  { %854 = vmatprep.subr.mxu0 %v1109_v0 }
  0x6f   :  { %855 = vmatpush3.xpose.msra.mxu0 %v115_v13 }
  0x70   :  { %856 = vmatprep.subr.mxu0 %v1109_v0 }
  0x73   :  { %857 = vmatpush3.xpose.msra.mxu0 %v114_v14 }
  0x74   :  { %858 = vmatprep.subr.mxu0 %v1109_v0 }
  0x77   :  { %859 = vmatpush3.xpose.msra.mxu0 %v113_v15 }
  0x78   :  { %860 = vmatprep.subr.mxu0 %v1109_v0 }
  0x7b   :  { %861 = vmatpush3.xpose.msra.mxu0 %v112_v16 }
  0x7c   :  { %920 = vmatprep.subr.mxu0 %v1109_v0 }
  0x7e   :  { %863 = vmatmul.mubr.f32.vlgmr.msra.gmra.mxu0 %v111_v17 }
  0x7f   :  { %952 = vmatprep.mubr.msk.f32.mxu0 %vm1110_vm0, %v1109_v0  ;;  %921 = vmatpush3.xpose.msra.mxu0 %v668_v25 }
  0x80   :  { %922 = vmatprep.subr.mxu0 %v1109_v0 }
 0x13e   :  { %v197_v19 = vpop.f32.mrf.mxu0 }
 0x13f   :  { %866 = vmatpush3.xpose.msra.mxu1 %v197_v19  ;;  %v207_v20 = vmul.f32 %v764_v18, %v197_v19 }
 0x140   :  { %v864_v22 = vpop.f32.mrf.mxu0  ;;  %870 = vmatprep.subr.mxu1 %v1109_v0 }
 0x141   :  { %208 = vadd.xlane.f32.xlu0 %v207_v20 }
 0x142   :  { %868 = vmatmul.mubr.f32.vlgmr.msra.gmra.mxu1 %v128_v21 }
 0x143   :  { %871 = vmatpush3.msra.mxu1 %v197_v19  ;;  %872 = vmatprep.mubr.msk.f32.mxu1 %vm1110_vm0, %v1109_v0 }
 0x144   :  { %875 = vmatprep.subr.mxu1 %v1109_v0 }
 0x1ca   :  { %v209_v31 = vpop.xlane.xlu0 %208 }
 0x202   :  { %v276_v29 = vpop.f32.mrf.mxu1 }
 0x203   :  { %v283_v30 = vrot.slane %v276_v29, %v282_v27  ;;  %v665_v29 = vld [vmem:[#allocation10 + $0x60] sm:$0xff] }
 0x204   :  { %v869_v32 = vpop.f32.mrf.mxu1 }
 0x205   :  { %v284_v33 = vadd.f32 %v283_v30, %v209_v31  ;;  %v664_v30 = vld [vmem:[#allocation10 + $0x58] sm:$0xff]  ;;  %v663_v31 = vld [vmem:[#allocation10 + $0x50] sm:$0xff]  ;;  %v662_v32 = vld [vmem:[#allocation10 + $0x48] sm:$0xff] }
 0x207   :  { %v286_v34 = vmul.f32 0.2, %v284_v33  ;;  %vm285_vm2 = vcmp.ge.f32.partialorder %v284_v33, 0.0 }
 0x209   :  { %v287_v37 = vsel %vm285_vm2, %v284_v33, %v286_v34  ;;  %v661_v33 = vld [vmem:[#allocation10 + $0x40] sm:$0xff]  ;;  %v660_v34 = vld [vmem:[#allocation10 + $0x38] sm:$0xff] }
 0x20a   :  { %v288_v38 = vadd.f32 %v287_v37, %v1241_v36  ;;  %v657_v37 = vld [vmem:[#allocation10 + $0x20] sm:$0xff] }
 0x20c   :  { %v290_v39 = vsel %vm289_vm3, %v288_v38, -inf }
 0x20d   :  { %291 = vmax.xlane.f32.xlu0 %v290_v39  ;;  %v655_v39 = vld [vmem:[#allocation10 + $0x10] sm:$0xff] }
 0x296   :  { %v292_v40 = vpop.xlane.xlu0 %291 }
 0x297   :  { %v293_v41 = vsub.f32 %v288_v38, %v292_v40  ;;  %v656_v38 = vld [vmem:[#allocation10 + $0x18] sm:$0xff]  ;;  %v654_v40 = vld [vmem:[#allocation10 + $0x8] sm:$0xff] }
 0x299   :  { %v294_v42 = vmul.f32 1.442695, %v293_v41 }
 0x29b   :  { %966 = vpow2.f32 %v294_v42 }
 0x2a8   :  { %v967_v43 = vpop.eup %966 }
 0x2a9   :  { %v296_v44 = vsel %vm289_vm3, %v967_v43, 0.0 }
 0x2aa   :  { %297 = vadd.xlane.f32.xlu1 %v296_v44  ;;  %v653_v44 = vld [vmem:[#allocation10] sm:$0xff] }
 0x333   :  { %v298_v45 = vpop.xlane.xlu1 %297 }
 0x334   :  { %968 = vrcp.f32 %v298_v45  ;;  %v768_v45 = vld [vmem:[%s1318_s9] ss:$0 sm:$0xff] }
 0x341   :  { %v969_v46 = vpop.eup %968 }
 0x342   :  { %v300_v47 = vmul.f32 %v969_v46, %v967_v43 }
 0x344   :  { %873 = vmatmul.mubr.msk.f32.vlgmr.msra.gmra.mxu1 %vm289_vm3, %v300_v47 }
 0x345   :  { %876 = vmatpush3.xpose.msra.mxu1 %v398_v48  ;;  %907 = vmatprep.mubr.msk.f32.mxu1 %vm1110_vm0, %v1109_v0 }
 0x346   :  { %877 = vmatprep.subr.mxu1 %v1109_v0 }
 0x349   :  { %878 = vmatpush3.xpose.msra.mxu1 %v397_v49 }
 0x34a   :  { %879 = vmatprep.subr.mxu1 %v1109_v0 }
 0x34d   :  { %880 = vmatpush3.xpose.msra.mxu1 %v396_v50 }
 0x34e   :  { %881 = vmatprep.subr.mxu1 %v1109_v0 }
 0x351   :  { %882 = vmatpush3.xpose.msra.mxu1 %v395_v51 }
 0x352   :  { %883 = vmatprep.subr.mxu1 %v1109_v0 }
 0x355   :  { %884 = vmatpush3.xpose.msra.mxu1 %v394_v52 }
 0x356   :  { %885 = vmatprep.subr.mxu1 %v1109_v0 }
 0x359   :  { %886 = vmatpush3.xpose.msra.mxu1 %v393_v53 }
 0x35a   :  { %887 = vmatprep.subr.mxu1 %v1109_v0 }
 0x35d   :  { %888 = vmatpush3.xpose.msra.mxu1 %v392_v54 }
 0x35e   :  { %889 = vmatprep.subr.mxu1 %v1109_v0 }
 0x361   :  { %890 = vmatpush3.xpose.msra.mxu1 %v391_v55 }
 0x362   :  { %891 = vmatprep.subr.mxu1 %v1109_v0 }
 0x365   :  { %892 = vmatpush3.xpose.msra.mxu1 %v390_v56 }
 0x366   :  { %893 = vmatprep.subr.mxu1 %v1109_v0 }
 0x369   :  { %894 = vmatpush3.xpose.msra.mxu1 %v389_v57 }
 0x36a   :  { %895 = vmatprep.subr.mxu1 %v1109_v0 }
 0x36d   :  { %896 = vmatpush3.xpose.msra.mxu1 %v388_v58 }
 0x36e   :  { %897 = vmatprep.subr.mxu1 %v1109_v0 }
 0x371   :  { %898 = vmatpush3.xpose.msra.mxu1 %v387_v59 }
 0x372   :  { %899 = vmatprep.subr.mxu1 %v1109_v0 }
 0x375   :  { %900 = vmatpush3.xpose.msra.mxu1 %v386_v60 }
 0x376   :  { %901 = vmatprep.subr.mxu1 %v1109_v0 }
 0x379   :  { %902 = vmatpush3.xpose.msra.mxu1 %v385_v61 }
 0x37a   :  { %903 = vmatprep.subr.mxu1 %v1109_v0 }
 0x37d   :  { %904 = vmatpush3.xpose.msra.mxu1 %v384_v62 }
 0x37e   :  { %905 = vmatprep.subr.mxu1 %v1109_v0 }
 0x381   :  { %906 = vmatpush3.xpose.msra.mxu1 %v383_v63 }
 0x382   :  { %910 = vmatprep.subr.mxu1 %v1109_v0 }
 0x404   :  { %v376_v2 = vpop.f32.mrf.mxu1 }
 0x405   :  { %v377_v3 = vadd.f32 %v765_v1, %v376_v2 }
 0x406   :  { %v874_v4 = vpop.f32.mrf.mxu1 }
 0x407   :  { %vm380_vm4 = vcmp.ge.f32.partialorder %v377_v3, 0.0  ;;  %v381_v5 = vmul.f32 0.01, %v377_v3 }
 0x409   :  { %v382_v6 = vsel %vm380_vm4, %v377_v3, %v381_v5 }
 0x40a   :  { %908 = vmatmul.mubr.f32.vlgmr.msra.gmra.mxu1 %v382_v6 }
 0x40b   :  { %912 = vmatprep.mubr.msk.f32.mxu1 %vm1110_vm0, %v1109_v0 }
 0x4ca   :  { %v468_v8 = vpop.f32.mrf.mxu1 }
 0x4cb   :  { %911 = vmatpush3.xpose.msra.mxu1 %v468_v8  ;;  %v478_v9 = vmul.f32 %v767_v7, %v468_v8 }
 0x4cc   :  { %v909_v11 = vpop.f32.mrf.mxu1  ;;  %915 = vmatprep.subr.mxu1 %v1109_v0 }
 0x4cd   :  { %479 = vadd.xlane.f32.xlu1 %v478_v9 }
 0x4ce   :  { %913 = vmatmul.mubr.f32.vlgmr.msra.gmra.mxu1 %v399_v10 }
 0x4cf   :  { %916 = vmatpush3.msra.mxu1 %v468_v8  ;;  %917 = vmatprep.mubr.msk.f32.mxu1 %vm1110_vm0, %v1109_v0 }
 0x556   :  { %v480_v14 = vpop.xlane.xlu1 %479 }
 0x58e   :  { %v547_v12 = vpop.f32.mrf.mxu1 }
 0x58f   :  { %v554_v13 = vrot.slane %v547_v12, %v282_v27  ;;  %v667_v27 = vld [vmem:[#allocation10 + $0x70] sm:$0xff] }
 0x590   :  { %v914_v15 = vpop.f32.mrf.mxu1  ;;  %923 = vmatpush3.xpose.msra.mxu0 %v667_v27 }
 0x591   :  { %v555_v16 = vadd.f32 %v554_v13, %v480_v14  ;;  %924 = vmatprep.subr.mxu0 %v1109_v0 }
 0x593   :  { %v557_v17 = vmul.f32 0.2, %v555_v16  ;;  %vm556_vm5 = vcmp.ge.f32.partialorder %v555_v16, 0.0 }
 0x594   :  { %925 = vmatpush3.xpose.msra.mxu0 %v666_v28 }
 0x595   :  { %v558_v18 = vsel %vm556_vm5, %v555_v16, %v557_v17  ;;  %926 = vmatprep.subr.mxu0 %v1109_v0 }
 0x596   :  { %v559_v19 = vadd.f32 %v558_v18, %v1241_v36  ;;  %v658_v36 = vld [vmem:[#allocation10 + $0x28] sm:$0xff] }
 0x598   :  { %v560_v20 = vsel %vm289_vm3, %v559_v19, -inf  ;;  %927 = vmatpush3.xpose.msra.mxu0 %v665_v29 }
 0x599   :  { %561 = vmax.xlane.f32.xlu0 %v560_v20  ;;  %928 = vmatprep.subr.mxu0 %v1109_v0 }
 0x59c   :  { %929 = vmatpush3.xpose.msra.mxu0 %v664_v30 }
 0x59d   :  { %930 = vmatprep.subr.mxu0 %v1109_v0 }
 0x5a0   :  { %931 = vmatpush3.xpose.msra.mxu0 %v663_v31 }
 0x5a1   :  { %932 = vmatprep.subr.mxu0 %v1109_v0 }
 0x5a4   :  { %933 = vmatpush3.xpose.msra.mxu0 %v662_v32 }
 0x5a5   :  { %934 = vmatprep.subr.mxu0 %v1109_v0 }
 0x5a8   :  { %935 = vmatpush3.xpose.msra.mxu0 %v661_v33 }
 0x5a9   :  { %936 = vmatprep.subr.mxu0 %v1109_v0 }
 0x5ac   :  { %937 = vmatpush3.xpose.msra.mxu0 %v660_v34 }
 0x5ad   :  { %938 = vmatprep.subr.mxu0 %v1109_v0 }
 0x5b0   :  { %939 = vmatpush3.xpose.msra.mxu0 %v659_v35 }
 0x5b1   :  { %940 = vmatprep.subr.mxu0 %v1109_v0 }
 0x5b4   :  { %941 = vmatpush3.xpose.msra.mxu0 %v658_v36 }
 0x5b5   :  { %942 = vmatprep.subr.mxu0 %v1109_v0 }
 0x5b8   :  { %943 = vmatpush3.xpose.msra.mxu0 %v657_v37 }
 0x5b9   :  { %944 = vmatprep.subr.mxu0 %v1109_v0 }
 0x5bc   :  { %945 = vmatpush3.xpose.msra.mxu0 %v656_v38 }
 0x5bd   :  { %946 = vmatprep.subr.mxu0 %v1109_v0 }
 0x5c0   :  { %947 = vmatpush3.xpose.msra.mxu0 %v655_v39 }
 0x5c1   :  { %948 = vmatprep.subr.mxu0 %v1109_v0 }
 0x5c4   :  { %949 = vmatpush3.xpose.msra.mxu0 %v654_v40 }
 0x5c5   :  { %950 = vmatprep.subr.mxu0 %v1109_v0  ;;  %v770_v0 = vld [vmem:[%s1320_s11] ss:$0 sm:$0xff] }
 0x5c8   :  { %951 = vmatpush3.xpose.msra.mxu0 %v653_v44 }
 0x622   :  { %v562_v21 = vpop.xlane.xlu0 %561 }
 0x623   :  { %v563_v22 = vsub.f32 %v559_v19, %v562_v21 }
 0x625   :  { %v564_v23 = vmul.f32 1.442695, %v563_v22 }
 0x627   :  { %970 = vpow2.f32 %v564_v23 }
 0x634   :  { %v971_v24 = vpop.eup %970 }
 0x635   :  { %v566_v26 = vsel %vm289_vm3, %v971_v24, 0.0 }
 0x636   :  { %567 = vadd.xlane.f32.xlu1 %v566_v26 }
 0x6bf   :  { %v568_v41 = vpop.xlane.xlu1 %567 }
 0x6c0   :  { %972 = vrcp.f32 %v568_v41 }
 0x6cd   :  { %v973_v42 = vpop.eup %972 }
 0x6ce   :  { %v570_v43 = vmul.f32 %v973_v42, %v971_v24 }
 0x6d0   :  { %918 = vmatmul.mubr.msk.f32.vlgmr.msra.gmra.mxu1 %vm289_vm3, %v570_v43 }
 0x790   :  { %v646_v46 = vpop.f32.mrf.mxu1 }
 0x791   :  { %v647_v47 = vadd.f32 %v768_v45, %v646_v46 }
 0x792   :  { %v919_v48 = vpop.f32.mrf.mxu1 }
 0x793   :  { %vm650_vm6 = vcmp.ge.f32.partialorder %v647_v47, 0.0  ;;  %v651_v49 = vmul.f32 0.01, %v647_v47 }
 0x795   :  { %v652_v50 = vsel %vm650_vm6, %v647_v47, %v651_v49 }
 0x796   :  { %953 = vmatmul.mubr.f32.vlgmr.msra.gmra.mxu0 %v652_v50 }
 0x856   :  { %v742_v51 = vpop.f32.mrf.mxu0 }
 0x857   :  { %v743_v52 = vadd.f32 %v770_v0, %v742_v51 }
 0x858   :  { %v954_v53 = vpop.f32.mrf.mxu0 }
 0x859   :  { %746 = vst [vmem:[#allocation11] sm:$0xff] %v743_v52 }
 0x85a   :  { %1085 = shalt.err (!%p1082_p1)
}
 0x85b   :  { %756 = dma.vmem_to_hbm [thread:$0]  %s754_s1, 128, %s1321_s12, [#allocation4]  }
 0x85c   :  { %1100 = dma.done.wait [#allocation4], 128  }
 0x85d   :  { %1101 = vsyncadd [#allocation4], 4294967168 }
 0x85e   :  { %760 = vsyncpa [#allocation3], 1 }
 0x85f   :  { %761 = vsyncpa [#allocation6], 1 }
 0x860   :  { %762 = vsyncpa [#allocation9], 1 }
 0x861   :  { %763 = vsyncpa [#allocation4], 1 }

</bundles_post_ra>
